<compile_context>
chip_gen: v7x
topology: tpu7x:2x2x1
jax: 0.10.0
libtpu: 0.0.40
codegen_flags: <defaults>
</compile_context>

<pallas_src>
import math
from functools import partial

import jax
import jax.numpy as jnp
from jax.experimental import pallas as pl
from jax.experimental.pallas import tpu as pltpu


# ---------------------------------------------------------------------------
# generation-aware VMEM budgets
# ---------------------------------------------------------------------------

_MiB = 1024 * 1024


def _round_up(x, m):
    return ((x + m - 1) // m) * m


def _round_down(x, m):
    return (x // m) * m


def _query_vmem_capacity():
    try:
        cap = int(pltpu.get_tpu_info().vmem_capacity_bytes)
        if cap > 0:
            return cap
    except Exception:
        pass
    return 64 * _MiB                       # safe floor: v7x has 64 MiB per TC


_VMEM_CAP = max(_query_vmem_capacity(), 64 * _MiB)
# Scoped-VMEM limit handed to Mosaic: 3/4 of physical, capped at 96 MiB
# (-> ~96 MiB on v5e/v6e, ~48 MiB on v7x).
_VMEM_LIMIT = max(min((_VMEM_CAP * 3) // 4, 96 * _MiB), 32 * _MiB)
# VMEM one pipelined block may claim: 2x in + 2x out double buffers plus ~3
# block-sized f32 temps, with headroom left for compiler scratch / params.
_BLOCK_ALLOWANCE = (_VMEM_LIMIT * 2) // 3
_MIN_GRID_BLOCKS = 4                       # pipelining + both v7x TensorCores
_SPLIT_THRESHOLD = 1 * _MiB                # only split tensors worth splitting


def _sublane_pack(dtype):
    # sublane packing: 8 rows for 4-byte, 16 for 2-byte, 32 for 1-byte dtypes
    return 8 * max(1, 4 // jnp.dtype(dtype).itemsize)


def _padded_bytes(block_shape, dtype):
    """VMEM footprint of one block after (sublane, lane) tile padding."""
    dims = tuple(int(d) for d in block_shape)
    itemsize = jnp.dtype(dtype).itemsize
    if len(dims) == 1:
        lead, sub, lane = 1, 1, dims[0]
    else:
        lead = math.prod(dims[:-2]) if len(dims) > 2 else 1
        sub, lane = dims[-2], dims[-1]
    return (lead * _round_up(max(sub, 1), _sublane_pack(dtype))
            * _round_up(max(lane, 1), 128) * itemsize)


def _block_cost(block_shape, dtype):
    """Estimated VMEM one pipelined block claims (dbuf'd I/O + f32 temps)."""
    io = _padded_bytes(block_shape, dtype)
    f32 = _padded_bytes(block_shape, jnp.float32)
    return 4 * io + 3 * f32


def _call_vmem_limit(block_shape, dtype):
    """Per-call scoped-VMEM limit; bumped only if a single block needs more."""
    needed = _block_cost(block_shape, dtype) + 2 * _MiB
    return int(max(_VMEM_LIMIT, min(needed, _VMEM_CAP - 4 * _MiB)))


def _choose_block_rows(n_rows, lane_width, dtype):
    """Rows per block for a (rows, lane_width) stream (multiple of 8)."""
    if n_rows <= 8:
        return max(int(n_rows), 1)
    per_row = max(_block_cost((64, lane_width), dtype) // 64, 1)
    rows = _round_down(max(_BLOCK_ALLOWANCE // per_row, 8), 8)
    io_total = n_rows * lane_width * jnp.dtype(dtype).itemsize
    if io_total >= _SPLIT_THRESHOLD:
        # keep >= _MIN_GRID_BLOCKS blocks in flight once the tensor is big
        # enough that each block is still a decent DMA (v7x dual TC + pipeline)
        rows = min(rows, max(8, _round_up(pl.cdiv(n_rows, _MIN_GRID_BLOCKS), 8)))
    rows = min(rows, _round_down(n_rows, 8))
    return max(int(rows), 8)


# ---------------------------------------------------------------------------
# kernels
# ---------------------------------------------------------------------------

def _ln_lane_kernel(x_ref, w_ref, b_ref, o_ref, *, eps):
    """channels_last generic: x_ref is (block_rows, C); reduce along lanes."""
    x = x_ref[...].astype(jnp.float32)
    mean = jnp.mean(x, axis=-1, keepdims=True)
    xc = x - mean
    var = jnp.mean(xc * xc, axis=-1, keepdims=True)        # biased variance
    inv = jax.lax.rsqrt(var + eps)
    w = w_ref[...].astype(jnp.float32)                     # (1, C)
    b = b_ref[...].astype(jnp.float32)                     # (1, C)
    o_ref[...] = (xc * inv * w + b).astype(o_ref.dtype)


def _ln_packed_lane_kernel(x_ref, w_ref, b_ref, o_ref, *, eps, c):
    """channels_last, small C, packed lane-dense.

    x_ref is (block_rows, width) with width a multiple of 128; every group of
    `c` consecutive lanes is one independent LayerNorm row.  Per-group sums are
    a segmented all-reduce done with a log2(c) roll+add tree on the XLU (an
    otherwise idle unit here), so loads, compute and stores all stay lane-dense
    (no masked vst / lane-sparse vregs for C < 128).
    """
    width = x_ref.shape[-1]
    x = x_ref[...].astype(jnp.float32)

    lane = jax.lax.broadcasted_iota(jnp.int32, (1, width), 1)
    seg = (lane // c).astype(jnp.float32)                  # segment id per lane

    def seg_allsum(v):
        s = v
        shift = 1
        while shift < c:
            # `keep` marks lanes whose rolled-in partner lies in the same
            # c-lane segment; elsewhere use the roll displaced by +/- c.
            # Comparing rolled segment ids keeps this correct regardless of
            # the hardware roll direction.
            keep = (pltpu.roll(seg, shift=shift, axis=1) == seg)
            keep = keep.astype(jnp.float32)                # (1, width)
            near = pltpu.roll(s, shift=shift, axis=1)
            far = pltpu.roll(s, shift=(shift - c) % width, axis=1)
            s = s + near * keep + far * (1.0 - keep)
            shift *= 2
        return s

    inv_c = jnp.float32(1.0 / c)
    mean = seg_allsum(x) * inv_c
    xc = x - mean
    var = seg_allsum(xc * xc) * inv_c                      # biased variance
    inv = jax.lax.rsqrt(var + eps)
    w = w_ref[...].astype(jnp.float32)                     # (1, width) tiled
    b = b_ref[...].astype(jnp.float32)                     # (1, width) tiled
    o_ref[...] = (xc * inv * w + b).astype(o_ref.dtype)


def _ln_sublane_kernel(x_ref, w_ref, b_ref, o_ref, *, eps):
    """channels_first: x_ref is (bn, C, hw_tile); reduce along C (sublanes)."""
    x = x_ref[...].astype(jnp.float32)
    mean = jnp.mean(x, axis=1, keepdims=True)
    xc = x - mean
    var = jnp.mean(xc * xc, axis=1, keepdims=True)         # biased variance
    inv = jax.lax.rsqrt(var + eps)
    w = w_ref[...].astype(jnp.float32)                     # (1, C, 1)
    b = b_ref[...].astype(jnp.float32)                     # (1, C, 1)
    o_ref[...] = (xc * inv * w + b).astype(o_ref.dtype)


# ---------------------------------------------------------------------------
# wrappers
# ---------------------------------------------------------------------------

def _ln_channels_last_packed(x2d, weight, bias, eps, g):
    rows, C = x2d.shape
    width = g * C                                          # == 128
    prows = rows // g
    xp = x2d.reshape(prows, width)                         # free: slab is contiguous in HBM

    block_rows = _choose_block_rows(prows, width, xp.dtype)
    grid = (pl.cdiv(prows, block_rows),)

    w = jnp.tile(weight.reshape(-1), g).reshape(1, width)
    b = jnp.tile(bias.reshape(-1), g).reshape(1, width)

    kernel = partial(_ln_packed_lane_kernel, eps=eps, c=C)
    out = pl.pallas_call(
        kernel,
        out_shape=jax.ShapeDtypeStruct((prows, width), xp.dtype),
        grid_spec=pltpu.PrefetchScalarGridSpec(
            num_scalar_prefetch=0,
            grid=grid,
            in_specs=[
                pl.BlockSpec((block_rows, width), lambda i: (i, 0)),
                pl.BlockSpec((1, width), lambda i: (0, 0)),
                pl.BlockSpec((1, width), lambda i: (0, 0)),
            ],
            out_specs=pl.BlockSpec((block_rows, width), lambda i: (i, 0)),
        ),
        compiler_params=pltpu.CompilerParams(
            dimension_semantics=("parallel",),
            vmem_limit_bytes=_call_vmem_limit((block_rows, width), xp.dtype),
        ),
    )(xp, w, b)
    return out.reshape(rows, C)


def _ln_channels_last_generic(x2d, weight, bias, eps):
    rows, C = x2d.shape
    block_rows = _choose_block_rows(rows, C, x2d.dtype)
    grid = (pl.cdiv(rows, block_rows),)
    # TODO(synk): for C so large that even an 8-row block exceeds VMEM, a
    # two-pass reduction split over C would be needed (not the case here).

    kernel = partial(_ln_lane_kernel, eps=eps)
    return pl.pallas_call(
        kernel,
        out_shape=jax.ShapeDtypeStruct((rows, C), x2d.dtype),
        grid_spec=pltpu.PrefetchScalarGridSpec(
            num_scalar_prefetch=0,
            grid=grid,
            in_specs=[
                pl.BlockSpec((block_rows, C), lambda i: (i, 0)),
                pl.BlockSpec((1, C), lambda i: (0, 0)),
                pl.BlockSpec((1, C), lambda i: (0, 0)),
            ],
            out_specs=pl.BlockSpec((block_rows, C), lambda i: (i, 0)),
        ),
        compiler_params=pltpu.CompilerParams(
            dimension_semantics=("parallel",),
            vmem_limit_bytes=_call_vmem_limit((block_rows, C), x2d.dtype),
        ),
    )(x2d, weight.reshape(1, C), bias.reshape(1, C))


def _ln_channels_last(x, weight, bias, eps):
    C = x.shape[-1]
    rows = math.prod(x.shape[:-1]) if x.ndim > 1 else 1
    x2d = x.reshape(rows, C)
    if 0 < C < 128 and 128 % C == 0:
        g = 128 // C
        if g > 1 and rows % g == 0:
            out = _ln_channels_last_packed(x2d, weight, bias, eps, g)
            return out.reshape(x.shape)
    out = _ln_channels_last_generic(x2d, weight, bias, eps)
    return out.reshape(x.shape)


def _ln_channels_first(x, weight, bias, eps):
    # x: (N, C, *spatial) -- normalize over C without any HBM transpose: the
    # contiguous spatial axis stays on the 128-wide lanes, C sits on sublanes.
    N, C = x.shape[0], x.shape[1]
    HW = math.prod(x.shape[2:]) if x.ndim > 2 else 1
    x3 = x.reshape(N, C, HW)                               # free reshape
    dtype = x.dtype
    itemsize = jnp.dtype(dtype).itemsize

    sample_cost = _block_cost((1, C, HW), dtype)           # padding-aware
    total_io = N * C * HW * itemsize

    if sample_cost <= _BLOCK_ALLOWANCE:
        hw_tile = HW
        bn = int(max(1, min(N, _BLOCK_ALLOWANCE // max(sample_cost, 1))))
        if total_io >= _SPLIT_THRESHOLD:
            bn = min(bn, max(1, pl.cdiv(N, _MIN_GRID_BLOCKS)))
            if pl.cdiv(N, bn) < 2 and HW >= 2 * 128:
                hw_tile = max(128, _round_up(pl.cdiv(HW, _MIN_GRID_BLOCKS), 128))
    else:
        bn = 1
        if HW <= 128:
            hw_tile = HW          # < 128 lanes: masked stores are layout-inherent
        else:
            col_cost = max(_block_cost((1, C, 128), dtype), 1)
            hw_tile = 128 * int(max(_BLOCK_ALLOWANCE // col_cost, 1))
            hw_tile = min(hw_tile, _round_down(HW, 128))
            hw_tile = max(hw_tile, 128)
    grid = (pl.cdiv(N, bn), pl.cdiv(HW, hw_tile))

    kernel = partial(_ln_sublane_kernel, eps=eps)
    out = pl.pallas_call(
        kernel,
        out_shape=jax.ShapeDtypeStruct((N, C, HW), dtype),
        grid_spec=pltpu.PrefetchScalarGridSpec(
            num_scalar_prefetch=0,
            grid=grid,
            in_specs=[
                pl.BlockSpec((bn, C, hw_tile), lambda n, j: (n, 0, j)),
                pl.BlockSpec((1, C, 1), lambda n, j: (0, 0, 0)),
                pl.BlockSpec((1, C, 1), lambda n, j: (0, 0, 0)),
            ],
            out_specs=pl.BlockSpec((bn, C, hw_tile), lambda n, j: (n, 0, j)),
        ),
        compiler_params=pltpu.CompilerParams(
            dimension_semantics=("parallel", "parallel"),
            vmem_limit_bytes=_call_vmem_limit((bn, C, hw_tile), dtype),
        ),
    )(x3, weight.reshape(1, C, 1), bias.reshape(1, C, 1))
    return out.reshape(x.shape)


def layer_norm(x, weight, bias, eps=1e-6, data_format="channels_last"):
    """JAX/Pallas equivalent of the PyTorch LayerNorm module's forward."""
    if data_format == "channels_last":
        return _ln_channels_last(x, weight, bias, eps)
    elif data_format == "channels_first":
        return _ln_channels_first(x, weight, bias, eps)
    raise NotImplementedError(data_format)


# ---------------------------------------------------------------------------
# references (pure JAX) + self-test
# ---------------------------------------------------------------------------

def _ref_channels_first(x, weight, bias, eps):
    u = jnp.mean(x, axis=1, keepdims=True)
    s = jnp.mean((x - u) ** 2, axis=1, keepdims=True)
    xn = (x - u) / jnp.sqrt(s + eps)
    return weight[None, :, None, None] * xn + bias[None, :, None, None]


def _ref_channels_last(x, weight, bias, eps):
    u = jnp.mean(x, axis=-1, keepdims=True)
    s = jnp.mean((x - u) ** 2, axis=-1, keepdims=True)
    xn = (x - u) / jnp.sqrt(s + eps)
    return xn * weight + bias


if __name__ == "__main__":
    key = jax.random.PRNGKey(0)
    keys = jax.random.split(key, 9)
    eps = 1e-6

    # --- channels_first: NCHW, normalized over C (EdgeNeXt stem/downsample) --
    N, C, H, W = 2, 4, 16, 16
    x_cf = jax.random.normal(keys[0], (N, C, H, W), dtype=jnp.float32)
    w_cf = jax.random.normal(keys[1], (C,), dtype=jnp.float32) * 0.1 + 1.0
    b_cf = jax.random.normal(keys[2], (C,), dtype=jnp.float32) * 0.1
    out_cf = layer_norm(x_cf, w_cf, b_cf, eps=eps, data_format="channels_first")
    out_cf = jax.block_until_ready(out_cf)
    ref_cf = _ref_channels_first(x_cf, w_cf, b_cf, eps)
    assert out_cf.shape == (N, C, H, W)
    assert jnp.max(jnp.abs(out_cf - ref_cf)) < 1e-4

    # --- channels_last, C < 128 dividing 128 -> lane-dense packed path ------
    B, S, D1 = 2, 8, 32
    x_p = jax.random.normal(keys[3], (B, S, D1), dtype=jnp.float32)
    w_p = jax.random.normal(keys[4], (D1,), dtype=jnp.float32) * 0.1 + 1.0
    b_p = jax.random.normal(keys[5], (D1,), dtype=jnp.float32) * 0.1
    out_p = layer_norm(x_p, w_p, b_p, eps=eps, data_format="channels_last")
    out_p = jax.block_until_ready(out_p)
    ref_p = _ref_channels_last(x_p, w_p, b_p, eps)
    assert out_p.shape == (B, S, D1)
    assert jnp.max(jnp.abs(out_p - ref_p)) < 1e-4

    # --- channels_last, C not a divisor of 128 -> generic lane path ---------
    D2 = 168                                   # EdgeNeXt xxsmall last-stage dim
    x_g = jax.random.normal(keys[6], (B, S, D2), dtype=jnp.float32)
    w_g = jax.random.normal(keys[7], (D2,), dtype=jnp.float32) * 0.1 + 1.0
    b_g = jax.random.normal(keys[8], (D2,), dtype=jnp.float32) * 0.1
    out_g = layer_norm(x_g, w_g, b_g, eps=eps, data_format="channels_last")
    out_g = jax.block_until_ready(out_g)
    ref_g = _ref_channels_last(x_g, w_g, b_g, eps)
    assert out_g.shape == (B, S, D2)
    assert jnp.max(jnp.abs(out_g - ref_g)) < 1e-4

    print("KERNEL_OK")
</pallas_src>

<mosaic_0001>
module attributes {stable_mosaic.version = 11 : i64} {
  func.func @_ln_sublane_kernel(%arg0: i32, %arg1: i32, %arg2: memref<2x4x256xf32, #tpu.memory_space<vmem>>, %arg3: memref<1x4x1xf32, #tpu.memory_space<vmem>>, %arg4: memref<1x4x1xf32, #tpu.memory_space<vmem>>, %arg5: memref<2x4x256xf32, #tpu.memory_space<vmem>>) attributes {dimension_semantics = [#tpu.dimension_semantics<parallel>, #tpu.dimension_semantics<parallel>], iteration_bounds = array<i64: 1, 1>, scalar_prefetch = 0 : i64, scratch_operands = 0 : i64, tpu.core_type = #tpu.core_type<tc>, window_params = [{transform_indices = @transform_0, window_bounds = array<i64: 2, 4, 256>}, {pipeline_mode = #tpu.pipeline_mode<synchronous>, transform_indices = @transform_1, window_bounds = array<i64: 1, 4, 1>}, {pipeline_mode = #tpu.pipeline_mode<synchronous>, transform_indices = @transform_2, window_bounds = array<i64: 1, 4, 1>}, {transform_indices = @transform_3, window_bounds = array<i64: 2, 4, 256>}]} {
    %c0 = arith.constant 0 : index
    %c0_0 = arith.constant 0 : index
    %c0_1 = arith.constant 0 : index
    %0 = vector.load %arg2[%c0, %c0_0, %c0_1] : memref<2x4x256xf32, #tpu.memory_space<vmem>>, vector<2x4x256xf32>
    %cst = arith.constant dense<0.000000e+00> : vector<2x256xf32>
    %1 = vector.multi_reduction <add>, %0, %cst [1] : vector<2x4x256xf32> to vector<2x256xf32>
    %2 = vector.shape_cast %1 : vector<2x256xf32> to vector<2x1x256xf32>
    %cst_2 = arith.constant 4.000000e+00 : f32
    %3 = vector.broadcast %cst_2 : f32 to vector<2x1x256xf32>
    %4 = arith.divf %2, %3 : vector<2x1x256xf32>
    %5 = vector.broadcast %4 : vector<2x1x256xf32> to vector<2x4x256xf32>
    %6 = arith.subf %0, %5 : vector<2x4x256xf32>
    %7 = arith.mulf %6, %6 : vector<2x4x256xf32>
    %cst_3 = arith.constant dense<0.000000e+00> : vector<2x256xf32>
    %8 = vector.multi_reduction <add>, %7, %cst_3 [1] : vector<2x4x256xf32> to vector<2x256xf32>
    %9 = vector.shape_cast %8 : vector<2x256xf32> to vector<2x1x256xf32>
    %cst_4 = arith.constant 4.000000e+00 : f32
    %10 = vector.broadcast %cst_4 : f32 to vector<2x1x256xf32>
    %11 = arith.divf %9, %10 : vector<2x1x256xf32>
    %cst_5 = arith.constant 9.99999997E-7 : f32
    %12 = vector.broadcast %cst_5 : f32 to vector<2x1x256xf32>
    %13 = arith.addf %11, %12 : vector<2x1x256xf32>
    %14 = math.rsqrt %13 : vector<2x1x256xf32>
    %c0_6 = arith.constant 0 : index
    %c0_7 = arith.constant 0 : index
    %c0_8 = arith.constant 0 : index
    %15 = vector.load %arg3[%c0_6, %c0_7, %c0_8] : memref<1x4x1xf32, #tpu.memory_space<vmem>>, vector<1x4x1xf32>
    %c0_9 = arith.constant 0 : index
    %c0_10 = arith.constant 0 : index
    %c0_11 = arith.constant 0 : index
    %16 = vector.load %arg4[%c0_9, %c0_10, %c0_11] : memref<1x4x1xf32, #tpu.memory_space<vmem>>, vector<1x4x1xf32>
    %17 = vector.broadcast %14 : vector<2x1x256xf32> to vector<2x4x256xf32>
    %18 = arith.mulf %6, %17 : vector<2x4x256xf32>
    %19 = vector.broadcast %15 : vector<1x4x1xf32> to vector<2x4x256xf32>
    %20 = arith.mulf %18, %19 : vector<2x4x256xf32>
    %21 = vector.broadcast %16 : vector<1x4x1xf32> to vector<2x4x256xf32>
    %22 = arith.addf %20, %21 : vector<2x4x256xf32>
    %c0_12 = arith.constant 0 : index
    %c0_13 = arith.constant 0 : index
    %c0_14 = arith.constant 0 : index
    %23 = vector.load %arg5[%c0_12, %c0_13, %c0_14] : memref<2x4x256xf32, #tpu.memory_space<vmem>>, vector<2x4x256xf32>
    tpu.vector_store %arg5[%c0_12, %c0_13, %c0_14], %22 {strides = array<i32>} : memref<2x4x256xf32, #tpu.memory_space<vmem>>, vector<2x4x256xf32>,
    return
  }
  func.func @transform_0(%arg0: i32, %arg1: i32) -> (i32, i32, i32) {
    %c0_i32 = arith.constant 0 : i32
    %c0_i32_0 = arith.constant 0 : i32
    return %arg0, %c0_i32, %arg1 : i32, i32, i32
  }
  func.func @transform_1(%arg0: i32, %arg1: i32) -> (i32, i32, i32) {
    %c0_i32 = arith.constant 0 : i32
    %c0_i32_0 = arith.constant 0 : i32
    %c0_i32_1 = arith.constant 0 : i32
    %c0_i32_2 = arith.constant 0 : i32
    return %c0_i32, %c0_i32_0, %c0_i32_1 : i32, i32, i32
  }
  func.func @transform_2(%arg0: i32, %arg1: i32) -> (i32, i32, i32) {
    %c0_i32 = arith.constant 0 : i32
    %c0_i32_0 = arith.constant 0 : i32
    %c0_i32_1 = arith.constant 0 : i32
    %c0_i32_2 = arith.constant 0 : i32
    return %c0_i32, %c0_i32_0, %c0_i32_1 : i32, i32, i32
  }
  func.func @transform_3(%arg0: i32, %arg1: i32) -> (i32, i32, i32) {
    %c0_i32 = arith.constant 0 : i32
    %c0_i32_0 = arith.constant 0 : i32
    return %arg0, %c0_i32, %arg1 : i32, i32, i32
  }
}

</mosaic_0001>

<bundles_post_ra>
// kernel: tpu_custom_call.1
= control target key start
LH: loop header
LB: loop body
LE: loop exit
PB: predicated region body
PF: predicated region fallthrough
CT: control target
= control target key end

     0   :  { %8 = vsyncpa [#allocation3], 0  ;;  %s323_s0 = inlined_call_operand.hbm [shape: f32[2,4,256], index: 0, kind: input, shape index: {}]   ;;  %s324_s1 = inlined_call_operand.vmem [shape: f32[1,4,1], index: 1, kind: input, shape index: {}]   ;;  %s325_s2 = inlined_call_operand.vmem [shape: f32[1,4,1], index: 2, kind: input, shape index: {}]   ;;  %s326_s3 = inlined_call_operand.hbm [shape: f32[2,4,256], index: 3, kind: output, shape index: {}]  }
   0x1   :  { %9 = vsyncpa [#allocation4], 0  ;;  %s253_s12 = smov [#allocation2]   ;;  %s205_s16 = scalar_lea.hbm %s323_s0, 256 }
   0x2   :  { %s15_s13 = sshll.u32 %s253_s12, 4  ;;  %p206_p0 = scmp.ne.s32.totalorder %s323_s0, %s205_s16  ;;  %s16_s13 = int_to_ptr.vmem [resolvable:$true] %s15_s13 }
   0x3   :  { %p209_p1 = scmp.lt.u32.totalorder %s205_s16, %s323_s0 }
   0x5   :  { %p211_p2 = pnand %p209_p1, %p206_p0 }
   0x7   :  { %214 = shalt.err (!%p211_p2)
}
   0x8   :  { %s215_s21 = scalar_lea.vmem %s16_s13, 256  ;;  %p220_p4 = scmp.lt.s32.totalorder %s16_s13, %s16_s13 }
   0x9   :  { %p216_p3 = scmp.ne.s32.totalorder %s16_s13, %s215_s21  ;;  %p221_p5 = scmp.lt.s32.totalorder %s215_s21, %s215_s21 }
   0xb   :  { %p222_p6 = por %p221_p5, %p220_p4 }
   0xd   :  { %p223_p7 = pnand %p222_p6, %p216_p3 }
   0xf   :  { %226 = shalt.err (!%p223_p7)
}
  0x10   :  { %s254_s22 = smov 128   ;;  %s255_s23 = smov 8  }
  0x11   :  { %21 = dma.hbm_to_vmem [thread:$0]  %s323_s0, 256, %s16_s13, [#allocation3], %s254_s22, %s254_s22, %s255_s23  }
  0x12   :  { %249 = dma.done.wait [#allocation3], 256  }
  0x13   :  { %250 = vsyncadd [#allocation3], 4294967040  ;;  %v256_v0 = vmov 0   ;;  %v129_v1 = vld [vmem:[%s324_s1] sm:$0xf]  ;;  %v30_v4 = vld [vmem:[#allocation2 + $0x8] sm:$0xff] }
  0x14   :  { %194 = vset.pattern.permute.xlu0 %v256_v0  ;;  %v130_v2 = vld [vmem:[%s325_s2] sm:$0xf]  ;;  %vm37_vm0 = vcmask 1043456   ;;  %v34_v6 = vcombine.high %v30_v4, %v30_v4  ;;  %s258_s0 = smov [#allocation5]  }
  0x15   :  { %143 = vperm.xlu0 %194, %v129_v1   ;;  %v29_v3 = vld [vmem:[#allocation2] sm:$0xff]  ;;  %v52_v9 = vsel %vm37_vm0, %v30_v4, 0.0  ;;  %s176_s1 = sshll.u32 %s258_s0, 4  ;;  %s177_s1 = int_to_ptr.vmem [resolvable:$true] %s176_s1 }
  0x16   :  { %v33_v5 = vcombine.high %v29_v3, %v29_v3  ;;  %v38_v7 = vsel %vm37_vm0, %v29_v3, 0.0  ;;  %v59_v10 = vsel %vm37_vm0, %v34_v6, 0.0  ;;  %v53_v13 = vrot.slane %v52_v9, 4  ;;  %s227_s2 = scalar_lea.vmem %s177_s1, 256  ;;  %p232_p9 = scmp.lt.s32.totalorder %s177_s1, %s177_s1 }
  0x17   :  { %v39_v11 = vrot.slane %v38_v7, 4  ;;  %v60_v14 = vrot.slane %v59_v10, 4  ;;  %p228_p8 = scmp.ne.s32.totalorder %s177_s1, %s227_s2  ;;  %p233_p10 = scmp.lt.s32.totalorder %s227_s2, %s227_s2 }
  0x18   :  { %v45_v8 = vsel %vm37_vm0, %v33_v5, 0.0  ;;  %v54_v17 = vadd.f32 %v53_v13, %v52_v9 }
  0x19   :  { %157 = vperm.xlu0 %194, %v130_v2   ;;  %v46_v12 = vrot.slane %v45_v8, 4  ;;  %v40_v15 = vadd.f32 %v39_v11, %v38_v7  ;;  %v61_v18 = vadd.f32 %v60_v14, %v59_v10  ;;  %p234_p11 = por %p233_p10, %p232_p9 }
  0x1a   :  { %v55_v21 = vrot.slane %v54_v17, 2 }
  0x1b   :  { %v47_v16 = vadd.f32 %v46_v12, %v45_v8  ;;  %v41_v19 = vrot.slane %v40_v15, 2  ;;  %v62_v22 = vrot.slane %v61_v18, 2  ;;  %p235_p12 = pnand %p234_p11, %p228_p8 }
  0x1c   :  { %v56_v25 = vadd.f32 %v55_v21, %v54_v17  ;;  %v148_v21 = vlaneseq }
  0x1d   :  { %v48_v20 = vrot.slane %v47_v16, 2  ;;  %v42_v23 = vadd.f32 %v41_v19, %v40_v15  ;;  %v63_v26 = vadd.f32 %v62_v22, %v61_v18  ;;  %v257_v19 = vmov 839922192  }
  0x1e   :  { %v57_v29 = vrot.slane %v56_v25, 1 }
  0x1f   :  { %v49_v24 = vadd.f32 %v48_v20, %v47_v16  ;;  %v43_v27 = vrot.slane %v42_v23, 1  ;;  %v64_v30 = vrot.slane %v63_v26, 1  ;;  %v146_v20 = vunpack.c.l.s4 %v257_v19 }
  0x20   :  { %v58_v33 = vadd.f32 %v57_v29, %v56_v25 }
  0x21   :  { %v50_v28 = vrot.slane %v49_v24, 1  ;;  %v44_v31 = vadd.f32 %v43_v27, %v42_v23  ;;  %v65_v34 = vadd.f32 %v64_v30, %v63_v26  ;;  %v147_v25 = vunpack.c.0.s8 %v146_v20 }
  0x22   :  { %v69_v37 = vmul.f32 0.25, %v58_v33  ;;  %v149_v26 = vshrl.u32 %v148_v21, 7 }
  0x23   :  { %v51_v32 = vadd.f32 %v50_v28, %v49_v24  ;;  %v67_v35 = vmul.f32 0.25, %v44_v31  ;;  %v70_v38 = vmul.f32 0.25, %v65_v34 }
  0x24   :  { %v150_v28 = vsub.s32 %v147_v25, %v149_v26 }
  0x25   :  { %v68_v36 = vmul.f32 0.25, %v51_v32  ;;  %v76_v40 = vcombine.low %v69_v37, %v70_v38 }
  0x27   :  { %v75_v39 = vcombine.low %v67_v35, %v68_v36  ;;  %v80_v42 = vsub.f32 %v30_v4, %v76_v40 }
  0x29   :  { %v79_v41 = vsub.f32 %v29_v3, %v75_v39  ;;  %v82_v44 = vmul.f32 %v80_v42, %v80_v42 }
  0x2b   :  { %v81_v43 = vmul.f32 %v79_v41, %v79_v41  ;;  %v86_v46 = vcombine.high %v82_v44, %v82_v44  ;;  %v103_v48 = vsel %vm37_vm0, %v82_v44, 0.0 }
  0x2c   :  { %v104_v52 = vrot.slane %v103_v48, 4 }
  0x2d   :  { %v85_v45 = vcombine.high %v81_v43, %v81_v43  ;;  %v89_v47 = vsel %vm37_vm0, %v81_v43, 0.0  ;;  %v110_v51 = vsel %vm37_vm0, %v86_v46, 0.0 }
  0x2e   :  { %v90_v50 = vrot.slane %v89_v47, 4  ;;  %v111_v54 = vrot.slane %v110_v51, 4  ;;  %v105_v56 = vadd.f32 %v104_v52, %v103_v48 }
  0x2f   :  { %v96_v49 = vsel %vm37_vm0, %v85_v45, 0.0 }
  0x30   :  { %v97_v53 = vrot.slane %v96_v49, 4  ;;  %v91_v55 = vadd.f32 %v90_v50, %v89_v47  ;;  %v112_v58 = vadd.f32 %v111_v54, %v110_v51  ;;  %v106_v60 = vrot.slane %v105_v56, 2 }
  0x32   :  { %v98_v57 = vadd.f32 %v97_v53, %v96_v49  ;;  %v92_v59 = vrot.slane %v91_v55, 2  ;;  %v113_v62 = vrot.slane %v112_v58, 2  ;;  %v107_v0 = vadd.f32 %v106_v60, %v105_v56 }
  0x34   :  { %v99_v61 = vrot.slane %v98_v57, 2  ;;  %v93_v63 = vadd.f32 %v92_v59, %v91_v55  ;;  %v114_v2 = vadd.f32 %v113_v62, %v112_v58  ;;  %v108_v4 = vrot.slane %v107_v0, 1 }
  0x36   :  { %v100_v1 = vadd.f32 %v99_v61, %v98_v57  ;;  %v94_v3 = vrot.slane %v93_v63, 1  ;;  %v115_v6 = vrot.slane %v114_v2, 1  ;;  %v109_v8 = vadd.f32 %v108_v4, %v107_v0 }
  0x38   :  { %v101_v5 = vrot.slane %v100_v1, 1  ;;  %v95_v7 = vadd.f32 %v94_v3, %v93_v63  ;;  %v116_v10 = vadd.f32 %v115_v6, %v114_v2  ;;  %v119_v12 = vmul.f32 0.25, %v109_v8 }
  0x3a   :  { %v102_v9 = vadd.f32 %v101_v5, %v100_v1  ;;  %v117_v11 = vmul.f32 0.25, %v95_v7  ;;  %v120_v14 = vmul.f32 0.25, %v116_v10  ;;  %v123_v16 = vadd.f32 1e-06, %v119_v12 }
  0x3c   :  { %v118_v13 = vmul.f32 0.25, %v102_v9  ;;  %v121_v15 = vadd.f32 1e-06, %v117_v11  ;;  %v124_v18 = vadd.f32 1e-06, %v120_v14 }
  0x3e   :  { %v122_v17 = vadd.f32 1e-06, %v118_v13  ;;  %197 = vrsqrt.f32 %v121_v15 }
  0x3f   :  { %199 = vrsqrt.f32 %v123_v16 }
  0x40   :  { %201 = vrsqrt.f32 %v122_v17 }
  0x41   :  { %203 = vrsqrt.f32 %v124_v18 }
  0x48   :  { %v198_v22 = vpop.eup %197 }
  0x49   :  { %v200_v23 = vpop.eup %199 }
  0x4a   :  { %v202_v24 = vpop.eup %201 }
  0x4b   :  { %v204_v27 = vpop.eup %203  ;;  %v135_v29 = vcombine.low %v198_v22, %v202_v24 }
  0x4c   :  { %v136_v30 = vcombine.low %v200_v23, %v204_v27 }
  0x4d   :  { %v139_v32 = vmul.f32 %v135_v29, %v79_v41 }
  0x4e   :  { %v140_v33 = vmul.f32 %v136_v30, %v80_v42 }
  0x94   :  { %v144_v31 = vpop.permute.xlu0 %143 }
  0x95   :  { %v151_v34 = vrot.slane %v144_v31, %v150_v28 }
  0x97   :  { %v153_v36 = vmul.f32 %v151_v34, %v139_v32  ;;  %v154_v37 = vmul.f32 %v151_v34, %v140_v33 }
  0x98   :  { %v158_v35 = vpop.permute.xlu0 %157 }
  0x99   :  { %v165_v38 = vrot.slane %v158_v35, %v150_v28 }
  0x9b   :  { %v167_v39 = vadd.f32 %v165_v38, %v153_v36  ;;  %v168_v40 = vadd.f32 %v165_v38, %v154_v37 }
  0x9d   :  { %169 = vst [vmem:[#allocation5] sm:$0xff] %v167_v39  ;;  %170 = vst [vmem:[#allocation5 + $0x8] sm:$0xff] %v168_v40 }
  0x9e   :  { %238 = shalt.err (!%p235_p12)
}
  0x9f   :  { %s239_s5 = scalar_lea.hbm %s326_s3, 256 }
  0xa0   :  { %p240_p13 = scmp.ne.s32.totalorder %s326_s3, %s239_s5  ;;  %p243_p0 = scmp.lt.u32.totalorder %s239_s5, %s326_s3 }
  0xa2   :  { %p245_p1 = pnand %p243_p0, %p240_p13 }
  0xa4   :  { %248 = shalt.err (!%p245_p1)
}
  0xa5   :  { %182 = dma.vmem_to_hbm [thread:$0]  %s177_s1, 256, %s326_s3, [#allocation4], %s254_s22, %s254_s22, %s255_s23  }
  0xa6   :  { %251 = dma.done.wait [#allocation4], 256  }
  0xa7   :  { %252 = vsyncadd [#allocation4], 4294967040 }
  0xa8   :  { %186 = vsyncpa [#allocation3], 1 }
  0xa9   :  { %187 = vsyncpa [#allocation4], 1 }

</bundles_post_ra>
